<compile_context>
chip_gen: v7x
topology: tpu7x:2x2x1
jax: 0.10.0
libtpu: 0.0.40
codegen_flags: <defaults>
</compile_context>

<pallas_src>
import jax
import jax.numpy as jnp
from jax import lax
from jax.experimental import pallas as pl
from jax.experimental.pallas import tpu as pltpu


# ----------------------------- projection kernel -----------------------------

def proj_kernel(h_ref, w_ref, al_ref, ar_ref, z_ref, er_ref, el_ref):
    # z = h @ W   (bf16 operands, f32 accumulate)
    z = jnp.dot(h_ref[...], w_ref[...], preferred_element_type=jnp.float32)  # (TZ, OUT_P)
    z_ref[...] = z.astype(z_ref.dtype)                                       # bf16 out
    # er[v] = a_r . z_v   -> column (TZ, 1)
    er_ref[...] = lax.dot_general(
        z, ar_ref[...], (((1,), (1,)), ((), ())),
        preferred_element_type=jnp.float32)
    # el[u] = a_l . z_u   -> lane-major row (1, TZ) directly (no XLU transpose later)
    el_ref[...] = lax.dot_general(
        al_ref[...], z, (((1,), (1,)), ((), ())),
        preferred_element_type=jnp.float32)


# ----------------------------- attention kernel ------------------------------

def gat_attn_kernel(cnt_ref, er_ref, el_ref, z_ref, adjT_ref, out_ref, m_s, l_s):
    i = pl.program_id(0)
    k = pl.program_id(1)
    nk = pl.num_programs(1)

    @pl.when(k == 0)
    def _init():
        m_s[...] = jnp.full(m_s.shape, -jnp.inf, dtype=jnp.float32)
        l_s[...] = jnp.zeros(l_s.shape, jnp.float32)
        out_ref[...] = jnp.zeros(out_ref.shape, out_ref.dtype)

    # Skip all compute for adjacency tiles with zero edges (sparse graphs).
    @pl.when(cnt_ref[i * nk + k] > 0)
    def _body():
        mask = adjT_ref[...] != 0                                   # (TM, TS) bool, int8 cmp

        # scores s[dst, src] = leaky_relu(er[dst] + el[src])
        s = er_ref[...] + el_ref[...]                               # (TM,1)+(1,TS) -> (TM,TS)
        s = jnp.maximum(s, jnp.float32(0.01) * s)                   # leaky relu (mul + max)
        s = jnp.where(mask, s, jnp.float32(-1e30))                  # select-based mask

        # ---- flash-style online softmax over the src-tile axis ----
        m_prev = m_s[...]
        m_new = jnp.maximum(m_prev, jnp.max(s, axis=-1, keepdims=True))   # (TM, 1)
        corr = jnp.exp(m_prev - m_new)
        p = jnp.where(mask, jnp.exp(s - m_new), jnp.float32(0.0))         # exact 0 off-edges
        l_s[...] = corr * l_s[...] + jnp.sum(p, axis=-1, keepdims=True)
        # accumulate unnormalized aggregation straight into the resident output block
        out_ref[...] = corr * out_ref[...] + jnp.dot(
            p.astype(jnp.bfloat16), z_ref[...],
            preferred_element_type=jnp.float32)
        m_s[...] = m_new

    @pl.when(k == nk - 1)
    def _finalize():
        l = l_s[...]
        inv = pl.reciprocal(jnp.where(l > 0.0, l, 1.0))             # exact; once per dst tile
        # isolated nodes: l == 0 and out == 0 -> row stays 0 (DGL zero-fill)
        out_ref[...] = out_ref[...] * inv


# --------------------------------- wrapper -----------------------------------

def _round_up(x, m):
    return (x + m - 1) // m * m


def _pick_tiles(N):
    """TM (dst tile) / TS (src tile). TM | TS so padded col count >= padded row count.
    TM stays modest for small/medium N so v7x's two TCs both get dst tiles."""
    if N <= 512:
        TM = 128
    elif N <= 4096:
        TM = 256
    else:
        TM = 512
    TS = min(_round_up(N, TM), 1024)   # multiple of TM, capped (VMEM-friendly on v7x)
    return TM, TS


def gat_forward(h, W, a, adj):
    """h: (N, in_dim), W: (in_dim, out_dim) (fc weight pre-transposed),
    a: (2*out_dim,) (attn_fc weight), adj[u, v] = 1 iff edge u -> v."""
    N, in_dim = h.shape
    out_dim = W.shape[1]

    IN_P = _round_up(in_dim, 128)
    OUT_P = _round_up(out_dim, 128)
    TM, TS = _pick_tiles(N)
    N_PR = _round_up(N, TM)   # dst (row) padding
    N_PC = _round_up(N, TS)   # src (col) padding  (>= N_PR since TM | TS)

    # padded, TPU-friendly operands
    h_p = jnp.zeros((N_PC, IN_P), jnp.bfloat16).at[:N, :in_dim].set(h.astype(jnp.bfloat16))
    W_p = jnp.zeros((IN_P, OUT_P), jnp.bfloat16).at[:in_dim, :out_dim].set(W.astype(jnp.bfloat16))
    al_p = jnp.zeros((1, OUT_P), jnp.float32).at[0, :out_dim].set(a[:out_dim].astype(jnp.float32))
    ar_p = jnp.zeros((1, OUT_P), jnp.float32).at[0, :out_dim].set(a[out_dim:].astype(jnp.float32))
    # transposed adjacency: adjT[dst, src] = 1 iff edge src->dst, int8
    adjT_p = jnp.zeros((N_PR, N_PC), jnp.int8).at[:N, :N].set((adj.T > 0).astype(jnp.int8))

    # ---- pass 1: projection + per-node attention terms (once, not per dst tile) ----
    TZ = 128
    for cand in (1024, 512, 256):
        if N_PC % cand == 0:
            TZ = cand
            break

    z_p, er_p, el_p = pl.pallas_call(
        proj_kernel,
        out_shape=(
            jax.ShapeDtypeStruct((N_PC, OUT_P), jnp.bfloat16),   # z
            jax.ShapeDtypeStruct((N_PC, 1), jnp.float32),        # er (dst term, column)
            jax.ShapeDtypeStruct((1, N_PC), jnp.float32),        # el (src term, row)
        ),
        grid_spec=pltpu.PrefetchScalarGridSpec(
            num_scalar_prefetch=0,
            grid=(N_PC // TZ,),
            in_specs=[
                pl.BlockSpec((TZ, IN_P), lambda i: (i, 0)),
                pl.BlockSpec((IN_P, OUT_P), lambda i: (0, 0)),
                pl.BlockSpec((1, OUT_P), lambda i: (0, 0)),
                pl.BlockSpec((1, OUT_P), lambda i: (0, 0)),
            ],
            out_specs=[
                pl.BlockSpec((TZ, OUT_P), lambda i: (i, 0)),
                pl.BlockSpec((TZ, 1), lambda i: (i, 0)),
                pl.BlockSpec((1, TZ), lambda i: (0, i)),
            ],
        ),
        compiler_params=pltpu.CompilerParams(dimension_semantics=("parallel",)),
    )(h_p, W_p, al_p, ar_p)

    # ---- per-(i,k) tile edge counts for sparse-tile skipping (SMEM prefetch) ----
    nI, nK = N_PR // TM, N_PC // TS
    cnt = (adjT_p.astype(jnp.int32)
           .reshape(nI, TM, nK, TS)
           .sum(axis=(1, 3))
           .reshape(nI * nK))

    # ---- pass 2: masked online-softmax attention + aggregation ----
    out_p = pl.pallas_call(
        gat_attn_kernel,
        out_shape=jax.ShapeDtypeStruct((N_PR, OUT_P), jnp.float32),
        grid_spec=pltpu.PrefetchScalarGridSpec(
            num_scalar_prefetch=1,
            grid=(nI, nK),
            in_specs=[
                pl.BlockSpec((TM, 1), lambda i, k, c: (i, 0)),      # er (dst tile)
                pl.BlockSpec((1, TS), lambda i, k, c: (0, k)),      # el (src tile)
                pl.BlockSpec((TS, OUT_P), lambda i, k, c: (k, 0)),  # z  (src tile, bf16)
                pl.BlockSpec((TM, TS), lambda i, k, c: (i, k)),     # adjT tile (int8)
            ],
            out_specs=pl.BlockSpec((TM, OUT_P), lambda i, k, c: (i, 0)),
            scratch_shapes=[
                pltpu.VMEM((TM, 1), jnp.float32),   # running max m
                pltpu.VMEM((TM, 1), jnp.float32),   # running denom l
            ],
        ),
        compiler_params=pltpu.CompilerParams(
            dimension_semantics=("parallel", "arbitrary"),
        ),
    )(cnt, er_p, el_p, z_p, adjT_p)

    return out_p[:N, :out_dim]


# -------------------------------- reference ----------------------------------

def gat_reference(h, W, a, adj):
    """Pure-JAX (f32) reference mirroring the PyTorch/DGL forward."""
    out_dim = W.shape[1]
    z = h @ W
    el = z @ a[:out_dim]            # (N,)
    er = z @ a[out_dim:]            # (N,)
    s = el[None, :] + er[:, None]   # s[dst, src]
    s = jnp.where(s >= 0, s, 0.01 * s)
    mask = adj.T > 0
    masked = jnp.where(mask, s, -1e30)
    m = jnp.max(masked, axis=-1, keepdims=True)
    p = jnp.where(mask, jnp.exp(masked - m), 0.0)
    denom = jnp.sum(p, axis=-1, keepdims=True)
    alpha = p / jnp.where(denom > 0, denom, 1.0)
    return alpha @ z


if __name__ == "__main__":
    N, in_dim, out_dim = 8, 16, 32
    key = jax.random.PRNGKey(0)
    k_h, k_w, k_a = jax.random.split(key, 3)

    h = jax.random.normal(k_h, (N, in_dim), dtype=jnp.float32)
    # fc: nn.Linear(in_dim, out_dim, bias=False) -> weight (out_dim, in_dim); stored transposed.
    W = jax.random.normal(k_w, (in_dim, out_dim), dtype=jnp.float32) * 0.1
    # attn_fc: nn.Linear(2*out_dim, 1, bias=False) -> weight (1, 2*out_dim) stored as a vector.
    a = jax.random.normal(k_a, (2 * out_dim,), dtype=jnp.float32) * 0.1

    # Deterministic small graph: ring i -> (i+1) % N plus self-loops,
    # with node 3 made isolated (no in-edges) to exercise the zero-fill path.
    ids = jnp.arange(N)
    adj = jnp.zeros((N, N), dtype=jnp.float32)
    adj = adj.at[ids, (ids + 1) % N].set(1.0)
    adj = adj.at[ids, ids].set(1.0)
    adj = adj.at[:, 3].set(0.0)

    out = gat_forward(h, W, a, adj)
    jax.block_until_ready(out)

    ref = gat_reference(h, W, a, adj)
    assert out.shape == (N, out_dim)
    max_err = float(jnp.max(jnp.abs(out - ref)))
    # bf16 MXU operands -> looser tolerance than a pure-f32 layer
    assert jnp.allclose(out, ref, atol=2e-2, rtol=2e-2), f"mismatch vs reference (max abs err {max_err})"

    print("KERNEL_OK")
</pallas_src>

<mosaic_0001>
module attributes {stable_mosaic.version = 11 : i64} {
  func.func @proj_kernel(%arg0: i32, %arg1: memref<128x128xbf16, #tpu.memory_space<vmem>>, %arg2: memref<128x128xbf16, #tpu.memory_space<vmem>>, %arg3: memref<1x128xf32, #tpu.memory_space<vmem>>, %arg4: memref<1x128xf32, #tpu.memory_space<vmem>>, %arg5: memref<128x128xbf16, #tpu.memory_space<vmem>>, %arg6: memref<128x1xf32, #tpu.memory_space<vmem>>, %arg7: memref<1x128xf32, #tpu.memory_space<vmem>>) attributes {dimension_semantics = [#tpu.dimension_semantics<parallel>], iteration_bounds = array<i64: 1>, scalar_prefetch = 0 : i64, scratch_operands = 0 : i64, tpu.core_type = #tpu.core_type<tc>, window_params = [{transform_indices = @transform_0, window_bounds = array<i64: 128, 128>}, {pipeline_mode = #tpu.pipeline_mode<synchronous>, transform_indices = @transform_1, window_bounds = array<i64: 128, 128>}, {pipeline_mode = #tpu.pipeline_mode<synchronous>, transform_indices = @transform_2, window_bounds = array<i64: 1, 128>}, {pipeline_mode = #tpu.pipeline_mode<synchronous>, transform_indices = @transform_3, window_bounds = array<i64: 1, 128>}, {transform_indices = @transform_4, window_bounds = array<i64: 128, 128>}, {transform_indices = @transform_5, window_bounds = array<i64: 128, 1>}, {transform_indices = @transform_6, window_bounds = array<i64: 1, 128>}]} {
    %c0 = arith.constant 0 : index
    %c0_0 = arith.constant 0 : index
    %0 = vector.load %arg1[%c0, %c0_0] : memref<128x128xbf16, #tpu.memory_space<vmem>>, vector<128x128xbf16>
    %c0_1 = arith.constant 0 : index
    %c0_2 = arith.constant 0 : index
    %1 = vector.load %arg2[%c0_1, %c0_2] : memref<128x128xbf16, #tpu.memory_space<vmem>>, vector<128x128xbf16>
    %cst = arith.constant dense<0.000000e+00> : vector<128x128xf32>
    %2 = tpu.matmul %0, %1, %cst {dimension_numbers = #tpu.dot_dimension_numbers<[1], [0], [0], [1], [0, 0, 1, 1], [], []>} : vector<128x128xbf16>, vector<128x128xbf16>, vector<128x128xf32> -> vector<128x128xf32>
    %3 = arith.truncf %2 : vector<128x128xf32> to vector<128x128xbf16>
    %c0_3 = arith.constant 0 : index
    %c0_4 = arith.constant 0 : index
    %4 = vector.load %arg5[%c0_3, %c0_4] : memref<128x128xbf16, #tpu.memory_space<vmem>>, vector<128x128xbf16>
    tpu.vector_store %arg5[%c0_3, %c0_4], %3 {strides = array<i32>} : memref<128x128xbf16, #tpu.memory_space<vmem>>, vector<128x128xbf16>,
    %c0_5 = arith.constant 0 : index
    %c0_6 = arith.constant 0 : index
    %5 = vector.load %arg4[%c0_5, %c0_6] : memref<1x128xf32, #tpu.memory_space<vmem>>, vector<1x128xf32>
    %cst_7 = arith.constant dense<0.000000e+00> : vector<128x1xf32>
    %6 = tpu.matmul %2, %5, %cst_7 {dimension_numbers = #tpu.dot_dimension_numbers<[1], [1], [0], [0], [0, 0, 1, 0], [], []>} : vector<128x128xf32>, vector<1x128xf32>, vector<128x1xf32> -> vector<128x1xf32>
    %c0_8 = arith.constant 0 : index
    %c0_9 = arith.constant 0 : index
    %7 = vector.load %arg6[%c0_8, %c0_9] : memref<128x1xf32, #tpu.memory_space<vmem>>, vector<128x1xf32>
    tpu.vector_store %arg6[%c0_8, %c0_9], %6 {strides = array<i32>} : memref<128x1xf32, #tpu.memory_space<vmem>>, vector<128x1xf32>,
    %c0_10 = arith.constant 0 : index
    %c0_11 = arith.constant 0 : index
    %8 = vector.load %arg3[%c0_10, %c0_11] : memref<1x128xf32, #tpu.memory_space<vmem>>, vector<1x128xf32>
    %cst_12 = arith.constant dense<0.000000e+00> : vector<1x128xf32>
    %9 = tpu.matmul %8, %2, %cst_12 {dimension_numbers = #tpu.dot_dimension_numbers<[1], [1], [0], [0], [0, 0, 1, 0], [], []>} : vector<1x128xf32>, vector<128x128xf32>, vector<1x128xf32> -> vector<1x128xf32>
    %c0_13 = arith.constant 0 : index
    %c0_14 = arith.constant 0 : index
    %10 = vector.load %arg7[%c0_13, %c0_14] : memref<1x128xf32, #tpu.memory_space<vmem>>, vector<1x128xf32>
    tpu.vector_store %arg7[%c0_13, %c0_14], %9 {strides = array<i32>} : memref<1x128xf32, #tpu.memory_space<vmem>>, vector<1x128xf32>,
    return
  }
  func.func @transform_0(%arg0: i32) -> (i32, i32) {
    %c0_i32 = arith.constant 0 : i32
    %c0_i32_0 = arith.constant 0 : i32
    return %arg0, %c0_i32 : i32, i32
  }
  func.func @transform_1(%arg0: i32) -> (i32, i32) {
    %c0_i32 = arith.constant 0 : i32
    %c0_i32_0 = arith.constant 0 : i32
    %c0_i32_1 = arith.constant 0 : i32
    return %c0_i32, %c0_i32_0 : i32, i32
  }
  func.func @transform_2(%arg0: i32) -> (i32, i32) {
    %c0_i32 = arith.constant 0 : i32
    %c0_i32_0 = arith.constant 0 : i32
    %c0_i32_1 = arith.constant 0 : i32
    return %c0_i32, %c0_i32_0 : i32, i32
  }
  func.func @transform_3(%arg0: i32) -> (i32, i32) {
    %c0_i32 = arith.constant 0 : i32
    %c0_i32_0 = arith.constant 0 : i32
    %c0_i32_1 = arith.constant 0 : i32
    return %c0_i32, %c0_i32_0 : i32, i32
  }
  func.func @transform_4(%arg0: i32) -> (i32, i32) {
    %c0_i32 = arith.constant 0 : i32
    %c0_i32_0 = arith.constant 0 : i32
    return %arg0, %c0_i32 : i32, i32
  }
  func.func @transform_5(%arg0: i32) -> (i32, i32) {
    %c0_i32 = arith.constant 0 : i32
    %c0_i32_0 = arith.constant 0 : i32
    return %arg0, %c0_i32 : i32, i32
  }
  func.func @transform_6(%arg0: i32) -> (i32, i32) {
    %c0_i32 = arith.constant 0 : i32
    %c0_i32_0 = arith.constant 0 : i32
    return %c0_i32, %arg0 : i32, i32
  }
}

</mosaic_0001>

<bundles_post_ra>
// kernel: tpu_custom_call.1
= control target key start
LH: loop header
LB: loop body
LE: loop exit
PB: predicated region body
PF: predicated region fallthrough
CT: control target
= control target key end

     0   :  { %12 = vsyncpa [#allocation3], 0  ;;  %s1074_s0 = inlined_call_operand.hbm [shape: bf16[128,128], index: 0, kind: input, shape index: {}]   ;;  %s1075_s1 = inlined_call_operand.hbm [shape: bf16[128,128], index: 1, kind: input, shape index: {}]   ;;  %s1076_s2 = inlined_call_operand.vmem [shape: f32[1,128], index: 2, kind: input, shape index: {}]   ;;  %s1077_s3 = inlined_call_operand.vmem [shape: f32[1,128], index: 3, kind: input, shape index: {}]   ;;  %s1078_s4 = inlined_call_operand.hbm [shape: bf16[128,128], index: 4, kind: output, shape index: {0}]   ;;  %s1079_s5 = inlined_call_operand.vmem [shape: f32[128,1], index: 5, kind: output, shape index: {1}]   ;;  %s1080_s6 = inlined_call_operand.hbm [shape: f32[1,128], index: 6, kind: output, shape index: {2}]  }
   0x1   :  { %13 = vsyncpa [#allocation6], 0 }
   0x2   :  { %14 = vsyncpa [#allocation4], 0 }
   0x3   :  { %15 = vsyncpa [#allocation9], 0  ;;  %s877_s21 = smov [#allocation2]   ;;  %s781_s25 = scalar_lea.hbm %s1074_s0, 1024 }
   0x4   :  { %s21_s22 = sshll.u32 %s877_s21, 4  ;;  %p782_p0 = scmp.ne.s32.totalorder %s1074_s0, %s781_s25  ;;  %s22_s22 = int_to_ptr.vmem [resolvable:$true] %s21_s22 }
   0x5   :  { %p785_p1 = scmp.lt.u32.totalorder %s781_s25, %s1074_s0 }
   0x7   :  { %p787_p2 = pnand %p785_p1, %p782_p0 }
   0x9   :  { %790 = shalt.err (!%p787_p2)
}
   0xa   :  { %s791_s30 = scalar_lea.vmem %s22_s22, 1024  ;;  %p796_p4 = scmp.lt.s32.totalorder %s22_s22, %s22_s22 }
   0xb   :  { %p792_p3 = scmp.ne.s32.totalorder %s22_s22, %s791_s30  ;;  %p797_p5 = scmp.lt.s32.totalorder %s791_s30, %s791_s30 }
   0xd   :  { %p798_p6 = por %p797_p5, %p796_p4 }
   0xf   :  { %p799_p7 = pnand %p798_p6, %p792_p3 }
  0x11   :  { %802 = shalt.err (!%p799_p7)
}
  0x12   :  { %s878_s7 = smov 64   ;;  %s879_s8 = smov 4  }
  0x13   :  { %27 = dma.hbm_to_vmem [thread:$0]  %s1074_s0, 1024, %s22_s22, [#allocation3], %s878_s7, %s878_s7, %s879_s8  }
  0x14   :  { %s880_s11 = smov [#allocation5]   ;;  %s803_s15 = scalar_lea.hbm %s1075_s1, 1024 }
  0x15   :  { %s33_s12 = sshll.u32 %s880_s11, 4  ;;  %p804_p8 = scmp.ne.s32.totalorder %s1075_s1, %s803_s15  ;;  %s34_s12 = int_to_ptr.vmem [resolvable:$true] %s33_s12 }
  0x16   :  { %p807_p9 = scmp.lt.u32.totalorder %s803_s15, %s1075_s1 }
  0x18   :  { %p809_p10 = pnand %p807_p9, %p804_p8 }
  0x1a   :  { %812 = shalt.err (!%p809_p10)
}
  0x1b   :  { %s813_s20 = scalar_lea.vmem %s34_s12, 1024  ;;  %p818_p12 = scmp.lt.s32.totalorder %s34_s12, %s34_s12 }
  0x1c   :  { %p814_p11 = scmp.ne.s32.totalorder %s34_s12, %s813_s20  ;;  %p819_p13 = scmp.lt.s32.totalorder %s813_s20, %s813_s20 }
  0x1e   :  { %p820_p0 = por %p819_p13, %p818_p12 }
  0x20   :  { %p821_p1 = pnand %p820_p0, %p814_p11 }
  0x22   :  { %824 = shalt.err (!%p821_p1)
}
  0x23   :  { %39 = dma.hbm_to_vmem [thread:$0]  %s1075_s1, 1024, %s34_s12, [#allocation6], %s878_s7, %s878_s7, %s879_s8  }
  0x24   :  { %869 = dma.done.wait [#allocation3], 1024  }
  0x25   :  { %870 = vsyncadd [#allocation3], 4294966272 }
  0x26   :  { %871 = dma.done.wait [#allocation6], 1024  }
  0x27   :  { %872 = vsyncadd [#allocation6], 4294966272  ;;  %v765_v0 = vld [vmem:[#allocation5] sm:$0xff]   ;;  %v766_v1 = vld [vmem:[#allocation5 + $0x8] sm:$0xff]   ;;  %v881_v16 = vmov 0.0|0.0   ;;  %vm882_vm0 = vmmov 0  }
  0x28   :  { %665 = vmatprep.subr.bf16.mxu0 %v765_v0  ;;  %v767_v2 = vld [vmem:[#allocation5 + $0x10] sm:$0xff]   ;;  %v768_v3 = vld [vmem:[#allocation5 + $0x18] sm:$0xff]   ;;  %v773_v4 = vld [vmem:[#allocation2] sm:$0xff]   ;;  %732 = vmatprep.subr.bf16.mxu1 %v881_v16  ;;  %v883_v17 = vmov 0.0   ;;  %vm411_vm1 = vcmask 7168   ;;  %s884_s9 = smov [#allocation7]  }
  0x29   :  { %666 = vmatpush3.bf16.msra.mxu0 %v765_v0  ;;  %681 = vmatprep.mubr.bf16.mxu0 %v773_v4  ;;  %v769_v5 = vld [vmem:[#allocation5 + $0x20] sm:$0xff]   ;;  %v770_v6 = vld [vmem:[#allocation5 + $0x28] sm:$0xff]   ;;  %v771_v7 = vld [vmem:[#allocation5 + $0x30] sm:$0xff]   ;;  %s505_s10 = sshll.u32 %s884_s9, 4  ;;  %s506_s10 = int_to_ptr.vmem [resolvable:$true] %s505_s10 }
  0x2a   :  { %667 = vmatprep.subr.bf16.mxu0 %v766_v1  ;;  %v772_v8 = vld [vmem:[#allocation5 + $0x38] sm:$0xff]   ;;  %v774_v9 = vld [vmem:[#allocation2 + $0x8] sm:$0xff]   ;;  %v775_v10 = vld [vmem:[#allocation2 + $0x10] sm:$0xff]   ;;  %729 = vmatprep.mubr.msk.f32.mxu1 %vm882_vm0, %v883_v17  ;;  %s825_s13 = scalar_lea.vmem %s506_s10, 1024  ;;  %p830_p3 = scmp.lt.s32.totalorder %s506_s10, %s506_s10 }
  0x2b   :  { %v776_v11 = vld [vmem:[#allocation2 + $0x18] sm:$0xff]   ;;  %v777_v12 = vld [vmem:[#allocation2 + $0x20] sm:$0xff]   ;;  %v778_v13 = vld [vmem:[#allocation2 + $0x28] sm:$0xff]   ;;  %p826_p2 = scmp.ne.s32.totalorder %s506_s10, %s825_s13  ;;  %p831_p4 = scmp.lt.s32.totalorder %s825_s13, %s825_s13 }
  0x2c   :  { %v779_v14 = vld [vmem:[#allocation2 + $0x30] sm:$0xff]   ;;  %v780_v15 = vld [vmem:[#allocation2 + $0x38] sm:$0xff]   ;;  %v955_v18 = vld [vmem:[%s1077_s3] ss:$0 sm:$0xff] }
  0x2d   :  { %668 = vmatpush3.bf16.msra.mxu0 %v766_v1  ;;  %v428_v59 = vld [vmem:[%s1076_s2] sm:$0x1]  ;;  %p832_p5 = por %p831_p4, %p830_p3 }
  0x2e   :  { %669 = vmatprep.subr.bf16.mxu0 %v767_v2 }
  0x2f   :  { %p833_p6 = pnand %p832_p5, %p826_p2 }
  0x31   :  { %670 = vmatpush3.bf16.msra.mxu0 %v767_v2 }
  0x32   :  { %671 = vmatprep.subr.bf16.mxu0 %v768_v3 }
  0x35   :  { %672 = vmatpush3.bf16.msra.mxu0 %v768_v3 }
  0x36   :  { %673 = vmatprep.subr.bf16.mxu0 %v769_v5 }
  0x39   :  { %674 = vmatpush3.bf16.msra.mxu0 %v769_v5 }
  0x3a   :  { %675 = vmatprep.subr.bf16.mxu0 %v770_v6 }
  0x3d   :  { %676 = vmatpush3.bf16.msra.mxu0 %v770_v6 }
  0x3e   :  { %677 = vmatprep.subr.bf16.mxu0 %v771_v7 }
  0x41   :  { %678 = vmatpush3.bf16.msra.mxu0 %v771_v7 }
  0x42   :  { %679 = vmatprep.subr.bf16.mxu0 %v772_v8 }
  0x45   :  { %680 = vmatpush3.bf16.msra.mxu0 %v772_v8 }
  0x48   :  { %682 = vmatmul.mubr.bf16.vlgmr.msra.gmra.mrb[0].mxu0 %v774_v9 }
  0x49   :  { %685 = vmatprep.mubr.bf16.mxu0 %v775_v10 }
  0x50   :  { %686 = vmatmul.mubr.bf16.gmra.mrb[4].mxu0 %v776_v11 }
  0x51   :  { %689 = vmatprep.mubr.bf16.mxu0 %v777_v12 }
  0x58   :  { %690 = vmatmul.mubr.bf16.gmra.mrb[8].mxu0 %v778_v13 }
  0x59   :  { %693 = vmatprep.mubr.bf16.mxu0 %v779_v14 }
  0x60   :  { %694 = vmatmul.mubr.bf16.gmra.mrb[12].mxu0 %v780_v15 }
 0x11b   :  { %v683_v19 = vpop.f32.mrb[0].mxu0 }
 0x11c   :  { %v213_v20 = vpop.f32.mrb[1].mxu0  ;;  %v365_v21 = vmul.f32 %v683_v19, %v955_v18 }
 0x11d   :  { %v684_v22 = vpop.f32.mrb[2].mxu0  ;;  %v363_v23 = vmul.f32 %v955_v18, %v213_v20 }
 0x11e   :  { %v593_v24 = vpack.c.bf16 %v684_v22, %v683_v19  ;;  %383 = vadd.xlane.f32.xlu1 %v365_v21  ;;  %v216_v25 = vpop.f32.mrb[3].mxu0  ;;  %v366_v27 = vmul.f32 %v684_v22, %v955_v18 }
 0x11f   :  { %379 = vadd.xlane.f32.xlu0 %v363_v23  ;;  %v588_v26 = vpack.c.bf16 %v216_v25, %v213_v20  ;;  %v364_v28 = vmul.f32 %v955_v18, %v216_v25 }
 0x120   :  { %625 = vst [vmem:[#allocation7 + $0x8] sm:$0xff] %v593_v24  }
 0x121   :  { %589 = vst [vmem:[#allocation7] sm:$0xff] %v588_v26   ;;  %734 = vmatpush3.bf16.xpose.msra.mxu1 %v588_v26 }
 0x122   :  { %385 = vadd.xlane.f32.xlu1 %v366_v27  ;;  %735 = vmatprep.subr.bf16.mxu1 %v881_v16 }
 0x123   :  { %381 = vadd.xlane.f32.xlu0 %v364_v28  ;;  %v687_v29 = vpop.f32.mrb[4].mxu0 }
 0x124   :  { %v229_v30 = vpop.f32.mrb[5].mxu0  ;;  %v369_v31 = vmul.f32 %v687_v29, %v955_v18 }
 0x125   :  { %v688_v32 = vpop.f32.mrb[6].mxu0  ;;  %v367_v37 = vmul.f32 %v955_v18, %v229_v30 }
 0x126   :  { %v603_v33 = vpack.c.bf16 %v688_v32, %v687_v29  ;;  %v370_v34 = vmul.f32 %v688_v32, %v955_v18  ;;  %v232_v35 = vpop.f32.mrb[7].mxu0 }
 0x127   :  { %391 = vadd.xlane.f32.xlu0 %v369_v31  ;;  %v598_v36 = vpack.c.bf16 %v232_v35, %v229_v30  ;;  %v368_v38 = vmul.f32 %v955_v18, %v232_v35 }
 0x128   :  { %627 = vst [vmem:[#allocation7 + $0x18] sm:$0xff] %v603_v33   ;;  %393 = vadd.xlane.f32.xlu1 %v370_v34 }
 0x129   :  { %737 = vmatpush3.bf16.xpose.msra.mxu1 %v593_v24  ;;  %626 = vst [vmem:[#allocation7 + $0x10] sm:$0xff] %v598_v36  }
 0x12a   :  { %738 = vmatprep.subr.bf16.mxu1 %v881_v16 }
 0x12b   :  { %387 = vadd.xlane.f32.xlu0 %v367_v37  ;;  %v691_v39 = vpop.f32.mrb[8].mxu0 }
 0x12c   :  { %389 = vadd.xlane.f32.xlu1 %v368_v38  ;;  %v245_v40 = vpop.f32.mrb[9].mxu0  ;;  %v373_v41 = vmul.f32 %v691_v39, %v955_v18 }
 0x12d   :  { %v692_v42 = vpop.f32.mrb[10].mxu0  ;;  %v371_v47 = vmul.f32 %v955_v18, %v245_v40 }
 0x12e   :  { %v613_v43 = vpack.c.bf16 %v692_v42, %v691_v39  ;;  %v374_v44 = vmul.f32 %v692_v42, %v955_v18  ;;  %v248_v45 = vpop.f32.mrb[11].mxu0 }
 0x12f   :  { %399 = vadd.xlane.f32.xlu0 %v373_v41  ;;  %v608_v46 = vpack.c.bf16 %v248_v45, %v245_v40  ;;  %v372_v48 = vmul.f32 %v955_v18, %v248_v45 }
 0x130   :  { %629 = vst [vmem:[#allocation7 + $0x28] sm:$0xff] %v613_v43   ;;  %401 = vadd.xlane.f32.xlu1 %v374_v44 }
 0x131   :  { %740 = vmatpush3.bf16.xpose.msra.mxu1 %v598_v36  ;;  %628 = vst [vmem:[#allocation7 + $0x20] sm:$0xff] %v608_v46  }
 0x132   :  { %741 = vmatprep.subr.bf16.mxu1 %v881_v16 }
 0x133   :  { %395 = vadd.xlane.f32.xlu0 %v371_v47  ;;  %v695_v49 = vpop.f32.mrb[12].mxu0 }
 0x134   :  { %397 = vadd.xlane.f32.xlu1 %v372_v48  ;;  %v261_v50 = vpop.f32.mrb[13].mxu0  ;;  %v377_v57 = vmul.f32 %v695_v49, %v955_v18 }
 0x135   :  { %v696_v51 = vpop.f32.mrb[14].mxu0  ;;  %v375_v52 = vmul.f32 %v955_v18, %v261_v50 }
 0x136   :  { %v623_v53 = vpack.c.bf16 %v696_v51, %v695_v49  ;;  %v264_v54 = vpop.f32.mrb[15].mxu0  ;;  %v378_v58 = vmul.f32 %v696_v51, %v955_v18 }
 0x137   :  { %v618_v55 = vpack.c.bf16 %v264_v54, %v261_v50  ;;  %v376_v56 = vmul.f32 %v955_v18, %v264_v54  ;;  %403 = vadd.xlane.f32.xlu0 %v375_v52 }
 0x138   :  { %631 = vst [vmem:[#allocation7 + $0x38] sm:$0xff] %v623_v53  }
 0x139   :  { %743 = vmatpush3.bf16.xpose.msra.mxu1 %v603_v33  ;;  %630 = vst [vmem:[#allocation7 + $0x30] sm:$0xff] %v618_v55   ;;  %405 = vadd.xlane.f32.xlu1 %v376_v56 }
 0x13a   :  { %744 = vmatprep.subr.bf16.mxu1 %v881_v16 }
 0x13b   :  { %407 = vadd.xlane.f32.xlu0 %v377_v57 }
 0x13d   :  { %409 = vadd.xlane.f32.xlu1 %v378_v58 }
 0x141   :  { %746 = vmatpush3.bf16.xpose.msra.mxu1 %v608_v46 }
 0x142   :  { %747 = vmatprep.subr.bf16.mxu1 %v881_v16 }
 0x149   :  { %749 = vmatpush3.bf16.xpose.msra.mxu1 %v613_v43 }
 0x14a   :  { %750 = vmatprep.subr.bf16.mxu1 %v881_v16 }
 0x151   :  { %752 = vmatpush3.bf16.xpose.msra.mxu1 %v618_v55 }
 0x152   :  { %753 = vmatprep.subr.bf16.mxu1 %v881_v16 }
 0x159   :  { %755 = vmatpush3.bf16.xpose.msra.mxu1 %v623_v53 }
 0x160   :  { %730 = vmatmul.mubr.f32.vlgmr.msra.gmra.mrb[0].mxu1 %v428_v59 }
 0x1ab   :  { %v384_v60 = vpop.xlane.xlu1 %383 }
 0x1ac   :  { %414 = vst.msk [vmem:[%s1079_s5 + $0x10] sm:$0xff] %vm411_vm1, %v384_v60  ;;  %v380_v61 = vpop.xlane.xlu0 %379 }
 0x1ad   :  { %412 = vst.msk [vmem:[%s1079_s5] sm:$0xff] %vm411_vm1, %v380_v61 }
 0x1af   :  { %v386_v62 = vpop.xlane.xlu1 %385 }
 0x1b0   :  { %415 = vst.msk [vmem:[%s1079_s5 + $0x18] sm:$0xff] %vm411_vm1, %v386_v62  ;;  %v382_v63 = vpop.xlane.xlu0 %381 }
 0x1b1   :  { %413 = vst.msk [vmem:[%s1079_s5 + $0x8] sm:$0xff] %vm411_vm1, %v382_v63 }
 0x1b4   :  { %v392_v0 = vpop.xlane.xlu0 %391 }
 0x1b5   :  { %418 = vst.msk [vmem:[%s1079_s5 + $0x30] sm:$0xff] %vm411_vm1, %v392_v0  ;;  %v394_v1 = vpop.xlane.xlu1 %393 }
 0x1b6   :  { %836 = shalt.err (!%p833_p6)
}
 0x1b7   :  { %s837_s16 = scalar_lea.hbm %s1078_s4, 1024 }
 0x1b8   :  { %p838_p7 = scmp.ne.s32.totalorder %s1078_s4, %s837_s16  ;;  %p841_p8 = scmp.lt.u32.totalorder %s837_s16, %s1078_s4 }
 0x1ba   :  { %p843_p9 = pnand %p841_p8, %p838_p7 }
 0x1bc   :  { %846 = shalt.err (!%p843_p9)
}
 0x1bd   :  { %511 = dma.vmem_to_hbm [thread:$0]  %s506_s10, 1024, %s1078_s4, [#allocation4], %s878_s7, %s878_s7, %s879_s8   ;;  %v388_v2 = vpop.xlane.xlu0 %387  ;;  %v390_v3 = vpop.xlane.xlu1 %389 }
 0x1be   :  { %419 = vst.msk [vmem:[%s1079_s5 + $0x38] sm:$0xff] %vm411_vm1, %v394_v1  ;;  %416 = vst.msk [vmem:[%s1079_s5 + $0x20] sm:$0xff] %vm411_vm1, %v388_v2  ;;  %s885_s16 = smov [#allocation8]  }
 0x1bf   :  { %417 = vst.msk [vmem:[%s1079_s5 + $0x28] sm:$0xff] %vm411_vm1, %v390_v3  ;;  %s520_s17 = sshll.u32 %s885_s16, 4  ;;  %s521_s17 = int_to_ptr.vmem [resolvable:$true] %s520_s17 }
 0x1c0   :  { %s847_s18 = scalar_lea.vmem %s521_s17, 16  ;;  %s851_s19 = scalar_lea.vmem %s521_s17, 32 }
 0x1c1   :  { %v400_v4 = vpop.xlane.xlu0 %399  ;;  %v402_v5 = vpop.xlane.xlu1 %401  ;;  %p848_p10 = scmp.ne.s32.totalorder %s521_s17, %s847_s18  ;;  %p852_p11 = scmp.lt.s32.totalorder %s521_s17, %s521_s17 }
 0x1c2   :  { %422 = vst.msk [vmem:[%s1079_s5 + $0x50] sm:$0xff] %vm411_vm1, %v400_v4  ;;  %423 = vst.msk [vmem:[%s1079_s5 + $0x58] sm:$0xff] %vm411_vm1, %v402_v5  ;;  %p853_p12 = scmp.lt.s32.totalorder %s851_s19, %s847_s18 }
 0x1c4   :  { %p854_p13 = por %p853_p12, %p852_p11 }
 0x1c5   :  { %v396_v6 = vpop.xlane.xlu0 %395  ;;  %v398_v7 = vpop.xlane.xlu1 %397 }
 0x1c6   :  { %420 = vst.msk [vmem:[%s1079_s5 + $0x40] sm:$0xff] %vm411_vm1, %v396_v6  ;;  %421 = vst.msk [vmem:[%s1079_s5 + $0x48] sm:$0xff] %vm411_vm1, %v398_v7  ;;  %p855_p0 = pnand %p854_p13, %p848_p10 }
 0x1c9   :  { %v404_v8 = vpop.xlane.xlu0 %403  ;;  %v406_v9 = vpop.xlane.xlu1 %405 }
 0x1ca   :  { %424 = vst.msk [vmem:[%s1079_s5 + $0x60] sm:$0xff] %vm411_vm1, %v404_v8  ;;  %425 = vst.msk [vmem:[%s1079_s5 + $0x68] sm:$0xff] %vm411_vm1, %v406_v9 }
 0x1cd   :  { %v408_v10 = vpop.xlane.xlu0 %407  ;;  %v410_v11 = vpop.xlane.xlu1 %409 }
 0x1ce   :  { %426 = vst.msk [vmem:[%s1079_s5 + $0x70] sm:$0xff] %vm411_vm1, %v408_v10  ;;  %427 = vst.msk [vmem:[%s1079_s5 + $0x78] sm:$0xff] %vm411_vm1, %v410_v11 }
 0x233   :  { %v495_v12 = vpop.f32.mrb[0].mxu1 }
 0x234   :  { %499 = vst [vmem:[#allocation8] sm:$0x1] %v495_v12  ;;  %v731_v13 = vpop.f32.mrb[1].mxu1 }
 0x235   :  { %858 = shalt.err (!%p855_p0)
}
 0x236   :  { %s859_s21 = scalar_lea.hbm %s1080_s6, 16 }
 0x237   :  { %p860_p1 = scmp.ne.s32.totalorder %s1080_s6, %s859_s21  ;;  %p863_p2 = scmp.lt.u32.totalorder %s859_s21, %s1080_s6 }
 0x239   :  { %p865_p3 = pnand %p863_p2, %p860_p1 }
 0x23b   :  { %868 = shalt.err (!%p865_p3)
}
 0x23c   :  { %523 = dma.vmem_to_hbm [thread:$0]  %s521_s17, 16, %s1080_s6, [#allocation9]  }
 0x23d   :  { %873 = dma.done.wait [#allocation4], 1024  }
 0x23e   :  { %874 = vsyncadd [#allocation4], 4294966272 }
 0x23f   :  { %875 = dma.done.wait [#allocation9], 16  }
 0x240   :  { %876 = vsyncadd [#allocation9], 4294967280 }
 0x241   :  { %532 = vsyncpa [#allocation3], 1 }
 0x242   :  { %533 = vsyncpa [#allocation6], 1 }
 0x243   :  { %534 = vsyncpa [#allocation4], 1 }
 0x244   :  { %535 = vsyncpa [#allocation9], 1 }

</bundles_post_ra>
